<compile_context>
chip_gen: v7x
topology: tpu7x:2x2x1
jax: 0.10.0
libtpu: 0.0.40
codegen_flags: <defaults>
</compile_context>

<pallas_src>
import jax
import jax.numpy as jnp
from jax.experimental import pallas as pl
from jax.experimental.pallas import tpu as pltpu


def _initial_s_kernel(feat_ref, enc_ref, mask_ref, vw_ref, rw_ref, rb_ref, out_ref):
    # feat_ref / enc_ref : (bB, T, D)      mask_ref : (bB, T)
    # vw_ref : (1, D)    rw_ref : (D, H_pad)    rb_ref : (1, H_pad)
    # Elementwise math in f32 (v5e VPU/EUP have no native bf16 path).
    feat = feat_ref[...].astype(jnp.float32)                    # (bB, T, D)
    mask = mask_ref[...].astype(jnp.float32)                    # (bB, T)
    vw = vw_ref[...].astype(jnp.float32)                        # (1, D)

    # scores = v(tanh(encoder_features)) as VPU multiply + lane reduce.
    e = jnp.tanh(feat)
    scores = jnp.sum(e * vw[None, :, :], axis=-1)               # (bB, T)

    # Fused masked softmax:
    #   softmax(s)*mask / (sum(softmax(s)*mask) + eps)
    # = ex*mask / (sum(ex*mask) + eps*sum(ex)),  ex = exp(s - max(s))
    m = jnp.max(scores, axis=-1, keepdims=True)
    ex = jnp.exp(scores - m)
    num = ex * mask
    den = (jnp.sum(num, axis=-1, keepdims=True)
           + 1e-12 * jnp.sum(ex, axis=-1, keepdims=True))
    # approx=False keeps bit-level parity with the reference; switch to
    # approx=True (pure EUP vrcp) when exact parity is not required.
    attn = num * pl.reciprocal(den)                             # (bB, T)

    # c_t = bmm(attn.unsqueeze(1), encoder_outputs) -> MXU batched contraction,
    # avoids materializing a (bB, T, D) broadcast intermediate.
    enc = enc_ref[...]
    ct3 = jnp.einsum('bqt,btd->bqd',
                     attn[:, None, :].astype(enc.dtype), enc,
                     preferred_element_type=jnp.float32)        # (bB, 1, D)
    c_t = ct3[:, 0, :]                                          # (bB, D)

    # s_t_1 = relu(reduce(c_t));   H padded to a lane-dense multiple of 128.
    s = jnp.dot(c_t, rw_ref[...], preferred_element_type=jnp.float32) + rb_ref[...]
    out_ref[...] = jnp.maximum(s, 0.0)


def get_initial_s_pallas(encoder_features, encoder_outputs, mask_select,
                         v_weight, reduce_weight, reduce_bias, *, block_b=None):
    """Returns (s_t_1, s_t_1), each of shape (1, B, H), like the PyTorch module."""
    B, T, D = encoder_features.shape
    H = reduce_weight.shape[0]

    # --- parameter prep (done once in the wrapper, not per grid step) --------
    H_pad = max(128, pl.cdiv(H, 128) * 128)                     # lane-dense output
    rw_t = jnp.zeros((D, H_pad), jnp.float32).at[:, :H].set(
        reduce_weight.T.astype(jnp.float32))
    rb = jnp.zeros((1, H_pad), jnp.float32).at[:, :H].set(
        reduce_bias.astype(jnp.float32)[None, :])
    vw = v_weight.reshape(1, D).astype(jnp.float32)

    # --- batch blocking ------------------------------------------------------
    if block_b is None:
        block_b = B if B <= 8 else 8                            # keep M>=8 for the MXU
    B_pad = pl.cdiv(B, block_b) * block_b
    if B_pad != B:                                              # zero-pad extra rows
        encoder_features = jnp.pad(encoder_features,
                                   ((0, B_pad - B), (0, 0), (0, 0)))
        encoder_outputs = jnp.pad(encoder_outputs,
                                  ((0, B_pad - B), (0, 0), (0, 0)))
        mask_select = jnp.pad(mask_select, ((0, B_pad - B), (0, 0)))

    grid = (B_pad // block_b,)

    # --- scoped VMEM budget (double-buffered inputs + f32 intermediates) -----
    itemsize = jnp.dtype(encoder_features.dtype).itemsize
    big_in = block_b * T * D * itemsize
    need = (2 * 2 * big_in                                      # 2 big inputs, 2 buffers
            + 2 * block_b * T * jnp.dtype(mask_select.dtype).itemsize
            + 2 * block_b * H_pad * 4                           # output double buffer
            + 2 * block_b * T * D * 4                           # f32 intermediates
            + (D * H_pad + H_pad + D) * 4                       # weights
            + (4 << 20))                                        # headroom
    vmem_limit = int(min(max(need, 32 << 20), 112 << 20))

    s_full = pl.pallas_call(
        _initial_s_kernel,
        out_shape=jax.ShapeDtypeStruct((B_pad, H_pad), jnp.float32),
        grid=grid,
        in_specs=[
            pl.BlockSpec((block_b, T, D), lambda i: (i, 0, 0)),   # encoder_features
            pl.BlockSpec((block_b, T, D), lambda i: (i, 0, 0)),   # encoder_outputs
            pl.BlockSpec((block_b, T), lambda i: (i, 0)),         # mask_select
            pl.BlockSpec((1, D), lambda i: (0, 0)),               # v weight
            pl.BlockSpec((D, H_pad), lambda i: (0, 0)),           # reduce weight^T (padded)
            pl.BlockSpec((1, H_pad), lambda i: (0, 0)),           # reduce bias (padded)
        ],
        out_specs=pl.BlockSpec((block_b, H_pad), lambda i: (i, 0)),
        compiler_params=pltpu.CompilerParams(
            dimension_semantics=("parallel",),
            vmem_limit_bytes=vmem_limit),
    )(encoder_features, encoder_outputs, mask_select, vw, rw_t, rb)

    s_t = s_full[:B, :H]                                        # drop padding
    s_t_1 = s_t[None, :, :]                                     # unsqueeze(0) -> (1, B, H)
    return (s_t_1, s_t_1)


def _reference(encoder_features, encoder_outputs, mask_select,
               v_weight, reduce_weight, reduce_bias):
    # pure-JAX reference mirroring the PyTorch forward exactly (two-step renorm)
    B, T, D = encoder_features.shape
    e = jnp.tanh(encoder_features)
    scores = (e.reshape(-1, D) @ v_weight.T).reshape(B, T)
    sm = jax.nn.softmax(scores, axis=1)
    attn_ = sm * mask_select
    attn = attn_ / (attn_.sum(1, keepdims=True) + 1e-12)
    c_t = jnp.einsum('bt,btd->bd', attn, encoder_outputs)
    s = jax.nn.relu(c_t @ reduce_weight.T + reduce_bias)
    return (s[None], s[None])


if __name__ == "__main__":
    B, T, D = 2, 8, 32
    H = D // 2

    key = jax.random.PRNGKey(0)
    k1, k2, k3, k4, k5, k6 = jax.random.split(key, 6)

    encoder_features = jax.random.normal(k1, (B, T, D), dtype=jnp.float32)
    encoder_outputs = jax.random.normal(k2, (B, T, D), dtype=jnp.float32)
    # binary-ish mask with some zeros (all-zero rows would give the same
    # ~0/eps behavior as the PyTorch original)
    mask_select = (jax.random.uniform(k3, (B, T)) > 0.3).astype(jnp.float32)

    # deterministic synthetic parameters (shapes from nn.Linear in __init__)
    v_weight = jax.random.normal(k4, (1, D), dtype=jnp.float32) * (1.0 / jnp.sqrt(D))
    reduce_weight = jax.random.normal(k5, (H, D), dtype=jnp.float32) * (1.0 / jnp.sqrt(D))
    reduce_bias = jax.random.normal(k6, (H,), dtype=jnp.float32) * 0.01

    out = get_initial_s_pallas(encoder_features, encoder_outputs, mask_select,
                               v_weight, reduce_weight, reduce_bias)
    jax.block_until_ready(out)

    ref = _reference(encoder_features, encoder_outputs, mask_select,
                     v_weight, reduce_weight, reduce_bias)

    assert out[0].shape == (1, B, H) and out[1].shape == (1, B, H)
    assert jnp.allclose(out[0], ref[0], atol=1e-5, rtol=1e-5)
    assert jnp.allclose(out[1], ref[1], atol=1e-5, rtol=1e-5)

    print("KERNEL_OK")
</pallas_src>

<mosaic_0001>
module attributes {stable_mosaic.version = 11 : i64} {
  func.func @_initial_s_kernel(%arg0: i32, %arg1: memref<2x8x32xf32, #tpu.memory_space<vmem>>, %arg2: memref<2x8x32xf32, #tpu.memory_space<vmem>>, %arg3: memref<2x8xf32, #tpu.memory_space<vmem>>, %arg4: memref<1x32xf32, #tpu.memory_space<vmem>>, %arg5: memref<32x128xf32, #tpu.memory_space<vmem>>, %arg6: memref<1x128xf32, #tpu.memory_space<vmem>>, %arg7: memref<2x128xf32, #tpu.memory_space<vmem>>) attributes {dimension_semantics = [#tpu.dimension_semantics<parallel>], iteration_bounds = array<i64: 1>, scalar_prefetch = 0 : i64, scratch_operands = 0 : i64, tpu.core_type = #tpu.core_type<tc>, window_params = [{transform_indices = @transform_0, window_bounds = array<i64: 2, 8, 32>}, {transform_indices = @transform_1, window_bounds = array<i64: 2, 8, 32>}, {transform_indices = @transform_2, window_bounds = array<i64: 2, 8>}, {pipeline_mode = #tpu.pipeline_mode<synchronous>, transform_indices = @transform_3, window_bounds = array<i64: 1, 32>}, {pipeline_mode = #tpu.pipeline_mode<synchronous>, transform_indices = @transform_4, window_bounds = array<i64: 32, 128>}, {pipeline_mode = #tpu.pipeline_mode<synchronous>, transform_indices = @transform_5, window_bounds = array<i64: 1, 128>}, {transform_indices = @transform_6, window_bounds = array<i64: 2, 128>}]} {
    %c0 = arith.constant 0 : index
    %c0_0 = arith.constant 0 : index
    %c0_1 = arith.constant 0 : index
    %0 = vector.load %arg1[%c0, %c0_0, %c0_1] : memref<2x8x32xf32, #tpu.memory_space<vmem>>, vector<2x8x32xf32>
    %c0_2 = arith.constant 0 : index
    %c0_3 = arith.constant 0 : index
    %1 = vector.load %arg3[%c0_2, %c0_3] : memref<2x8xf32, #tpu.memory_space<vmem>>, vector<2x8xf32>
    %c0_4 = arith.constant 0 : index
    %c0_5 = arith.constant 0 : index
    %2 = vector.load %arg4[%c0_4, %c0_5] : memref<1x32xf32, #tpu.memory_space<vmem>>, vector<1x32xf32>
    %3 = math.tanh %0 : vector<2x8x32xf32>
    %4 = vector.shape_cast %2 : vector<1x32xf32> to vector<1x1x32xf32>
    %5 = vector.broadcast %4 : vector<1x1x32xf32> to vector<2x8x32xf32>
    %6 = arith.mulf %3, %5 : vector<2x8x32xf32>
    %cst = arith.constant dense<0.000000e+00> : vector<2x8xf32>
    %7 = vector.multi_reduction <add>, %6, %cst [2] : vector<2x8x32xf32> to vector<2x8xf32>
    %cst_6 = arith.constant dense<0xFF800000> : vector<2xf32>
    %8 = vector.multi_reduction <maximumf>, %7, %cst_6 [1] : vector<2x8xf32> to vector<2xf32>
    %9 = vector.shape_cast %8 : vector<2xf32> to vector<2x1xf32>
    %10 = vector.broadcast %9 : vector<2x1xf32> to vector<2x8xf32>
    %11 = arith.subf %7, %10 : vector<2x8xf32>
    %12 = math.exp %11 : vector<2x8xf32>
    %13 = arith.mulf %12, %1 : vector<2x8xf32>
    %cst_7 = arith.constant dense<0.000000e+00> : vector<2xf32>
    %14 = vector.multi_reduction <add>, %13, %cst_7 [1] : vector<2x8xf32> to vector<2xf32>
    %15 = vector.shape_cast %14 : vector<2xf32> to vector<2x1xf32>
    %cst_8 = arith.constant dense<0.000000e+00> : vector<2xf32>
    %16 = vector.multi_reduction <add>, %12, %cst_8 [1] : vector<2x8xf32> to vector<2xf32>
    %17 = vector.shape_cast %16 : vector<2xf32> to vector<2x1xf32>
    %cst_9 = arith.constant 9.99999996E-13 : f32
    %18 = vector.broadcast %cst_9 : f32 to vector<2x1xf32>
    %19 = arith.mulf %18, %17 : vector<2x1xf32>
    %20 = arith.addf %15, %19 : vector<2x1xf32>
    %21 = tpu.reciprocal %20 : vector<2x1xf32> -> vector<2x1xf32>
    %22 = vector.broadcast %21 : vector<2x1xf32> to vector<2x8xf32>
    %23 = arith.mulf %13, %22 : vector<2x8xf32>
    %c0_10 = arith.constant 0 : index
    %c0_11 = arith.constant 0 : index
    %c0_12 = arith.constant 0 : index
    %24 = vector.load %arg2[%c0_10, %c0_11, %c0_12] : memref<2x8x32xf32, #tpu.memory_space<vmem>>, vector<2x8x32xf32>
    %25 = vector.shape_cast %23 : vector<2x8xf32> to vector<2x1x8xf32>
    "tpu.trace_start"() <{level = 10 : i32, message = "bqt,btd->bqd"}> : () -> ()
    %cst_13 = arith.constant dense<0.000000e+00> : vector<2x1x32xf32>
    %26 = tpu.matmul %25, %24, %cst_13 {dimension_numbers = #tpu.dot_dimension_numbers<[2], [1], [1], [2], [0, 0, 0, 1, 1, 2], [0], [0]>} : vector<2x1x8xf32>, vector<2x8x32xf32>, vector<2x1x32xf32> -> vector<2x1x32xf32>
    "tpu.trace_stop"() : () -> ()
    %27 = vector.shape_cast %26 : vector<2x1x32xf32> to vector<2x32xf32>
    %c0_14 = arith.constant 0 : index
    %c0_15 = arith.constant 0 : index
    %28 = vector.load %arg5[%c0_14, %c0_15] : memref<32x128xf32, #tpu.memory_space<vmem>>, vector<32x128xf32>
    %cst_16 = arith.constant dense<0.000000e+00> : vector<2x128xf32>
    %29 = tpu.matmul %27, %28, %cst_16 {dimension_numbers = #tpu.dot_dimension_numbers<[1], [0], [0], [1], [0, 0, 1, 1], [], []>} : vector<2x32xf32>, vector<32x128xf32>, vector<2x128xf32> -> vector<2x128xf32>
    %c0_17 = arith.constant 0 : index
    %c0_18 = arith.constant 0 : index
    %30 = vector.load %arg6[%c0_17, %c0_18] : memref<1x128xf32, #tpu.memory_space<vmem>>, vector<1x128xf32>
    %31 = vector.broadcast %30 : vector<1x128xf32> to vector<2x128xf32>
    %32 = arith.addf %29, %31 : vector<2x128xf32>
    %cst_19 = arith.constant 0.000000e+00 : f32
    %33 = vector.broadcast %cst_19 : f32 to vector<2x128xf32>
    %34 = arith.maximumf %32, %33 : vector<2x128xf32>
    %c0_20 = arith.constant 0 : index
    %c0_21 = arith.constant 0 : index
    %35 = vector.load %arg7[%c0_20, %c0_21] : memref<2x128xf32, #tpu.memory_space<vmem>>, vector<2x128xf32>
    tpu.vector_store %arg7[%c0_20, %c0_21], %34 {strides = array<i32>} : memref<2x128xf32, #tpu.memory_space<vmem>>, vector<2x128xf32>,
    return
  }
  func.func @transform_0(%arg0: i32) -> (i32, i32, i32) {
    %c0_i32 = arith.constant 0 : i32
    %c0_i32_0 = arith.constant 0 : i32
    %c0_i32_1 = arith.constant 0 : i32
    return %arg0, %c0_i32, %c0_i32_0 : i32, i32, i32
  }
  func.func @transform_1(%arg0: i32) -> (i32, i32, i32) {
    %c0_i32 = arith.constant 0 : i32
    %c0_i32_0 = arith.constant 0 : i32
    %c0_i32_1 = arith.constant 0 : i32
    return %arg0, %c0_i32, %c0_i32_0 : i32, i32, i32
  }
  func.func @transform_2(%arg0: i32) -> (i32, i32) {
    %c0_i32 = arith.constant 0 : i32
    %c0_i32_0 = arith.constant 0 : i32
    return %arg0, %c0_i32 : i32, i32
  }
  func.func @transform_3(%arg0: i32) -> (i32, i32) {
    %c0_i32 = arith.constant 0 : i32
    %c0_i32_0 = arith.constant 0 : i32
    %c0_i32_1 = arith.constant 0 : i32
    return %c0_i32, %c0_i32_0 : i32, i32
  }
  func.func @transform_4(%arg0: i32) -> (i32, i32) {
    %c0_i32 = arith.constant 0 : i32
    %c0_i32_0 = arith.constant 0 : i32
    %c0_i32_1 = arith.constant 0 : i32
    return %c0_i32, %c0_i32_0 : i32, i32
  }
  func.func @transform_5(%arg0: i32) -> (i32, i32) {
    %c0_i32 = arith.constant 0 : i32
    %c0_i32_0 = arith.constant 0 : i32
    %c0_i32_1 = arith.constant 0 : i32
    return %c0_i32, %c0_i32_0 : i32, i32
  }
  func.func @transform_6(%arg0: i32) -> (i32, i32) {
    %c0_i32 = arith.constant 0 : i32
    %c0_i32_0 = arith.constant 0 : i32
    return %arg0, %c0_i32 : i32, i32
  }
}

</mosaic_0001>

<bundles_post_ra>
// kernel: tpu_custom_call.1
= control target key start
LH: loop header
LB: loop body
LE: loop exit
PB: predicated region body
PF: predicated region fallthrough
CT: control target
= control target key end

     0   :  { %11 = vsyncpa [#allocation3], 0  ;;  %s762_s0 = inlined_call_operand.hbm [shape: f32[2,8,32], index: 0, kind: input, shape index: {}]   ;;  %s763_s1 = inlined_call_operand.hbm [shape: f32[2,8,32], index: 1, kind: input, shape index: {}]   ;;  %s764_s2 = inlined_call_operand.vmem [shape: f32[2,8], index: 2, kind: input, shape index: {}]   ;;  %s765_s3 = inlined_call_operand.vmem [shape: f32[1,32], index: 3, kind: input, shape index: {}]   ;;  %s766_s4 = inlined_call_operand.hbm [shape: f32[32,128], index: 4, kind: input, shape index: {}]   ;;  %s767_s5 = inlined_call_operand.vmem [shape: f32[1,128], index: 5, kind: input, shape index: {}]   ;;  %s768_s6 = inlined_call_operand.hbm [shape: f32[2,128], index: 6, kind: output, shape index: {}]  }
   0x1   :  { %12 = vsyncpa [#allocation6], 0 }
   0x2   :  { %13 = vsyncpa [#allocation4], 0  ;;  %s624_s21 = smov [#allocation5]   ;;  %s625_s23 = smov [#allocation2]  }
   0x3   :  { %s31_s22 = sshll.u32 %s624_s21, 4  ;;  %s19_s24 = sshll.u32 %s625_s23, 4  ;;  %s32_s22 = int_to_ptr.vmem [resolvable:$true] %s31_s22  ;;  %s669_s24 = int_to_ptr.vmem [resolvable:$true] %s19_s24 }
   0x4   :  { %s530_s27 = scalar_lea.hbm %s763_s1, 256 }
   0x5   :  { %p531_p0 = scmp.ne.s32.totalorder %s763_s1, %s530_s27  ;;  %p534_p1 = scmp.lt.u32.totalorder %s530_s27, %s763_s1 }
   0x7   :  { %p536_p2 = pnand %p534_p1, %p531_p0 }
   0x9   :  { %539 = shalt.err (!%p536_p2)
}
   0xa   :  { %s540_s8 = scalar_lea.vmem %s32_s22, 256  ;;  %p545_p4 = scmp.lt.s32.totalorder %s32_s22, %s32_s22 }
   0xb   :  { %p541_p3 = scmp.ne.s32.totalorder %s32_s22, %s540_s8  ;;  %p546_p5 = scmp.lt.s32.totalorder %s540_s8, %s540_s8 }
   0xd   :  { %p547_p6 = por %p546_p5, %p545_p4 }
   0xf   :  { %p548_p7 = pnand %p547_p6, %p541_p3 }
  0x11   :  { %551 = shalt.err (!%p548_p7)
}
  0x12   :  { %s626_s9 = smov 128   ;;  %s627_s10 = smov 8  }
  0x13   :  { %37 = dma.hbm_to_vmem [thread:$0]  %s763_s1, 256, %s32_s22, [#allocation6], %s626_s9, %s626_s9, %s627_s10  }
  0x14   :  { %s552_s15 = scalar_lea.hbm %s762_s0, 256 }
  0x15   :  { %p553_p8 = scmp.ne.s32.totalorder %s762_s0, %s552_s15  ;;  %p556_p9 = scmp.lt.u32.totalorder %s552_s15, %s762_s0 }
  0x17   :  { %p558_p10 = pnand %p556_p9, %p553_p8 }
  0x19   :  { %561 = shalt.err (!%p558_p10)
}
  0x1a   :  { %s562_s20 = scalar_lea.vmem %s669_s24, 256  ;;  %p567_p12 = scmp.lt.s32.totalorder %s669_s24, %s669_s24 }
  0x1b   :  { %p563_p11 = scmp.ne.s32.totalorder %s669_s24, %s562_s20  ;;  %p568_p13 = scmp.lt.s32.totalorder %s562_s20, %s562_s20 }
  0x1d   :  { %p569_p0 = por %p568_p13, %p567_p12 }
  0x1f   :  { %p570_p1 = pnand %p569_p0, %p563_p11 }
  0x21   :  { %573 = shalt.err (!%p570_p1)
}
  0x22   :  { %25 = dma.hbm_to_vmem [thread:$0]  %s762_s0, 256, %s669_s24, [#allocation3], %s626_s9, %s626_s9, %s627_s10  }
  0x23   :  { %s628_s22 = smov [#allocation7]   ;;  %s574_s27 = scalar_lea.hbm %s766_s4, 512 }
  0x24   :  { %s47_s23 = sshll.u32 %s628_s22, 4  ;;  %p575_p2 = scmp.ne.s32.totalorder %s766_s4, %s574_s27  ;;  %s48_s23 = int_to_ptr.vmem [resolvable:$true] %s47_s23 }
  0x25   :  { %p578_p3 = scmp.lt.u32.totalorder %s574_s27, %s766_s4 }
  0x27   :  { %p580_p4 = pnand %p578_p3, %p575_p2 }
  0x29   :  { %583 = shalt.err (!%p580_p4)
}
  0x2a   :  { %s584_s8 = scalar_lea.vmem %s48_s23, 512  ;;  %p589_p6 = scmp.lt.s32.totalorder %s48_s23, %s48_s23 }
  0x2b   :  { %p585_p5 = scmp.ne.s32.totalorder %s48_s23, %s584_s8  ;;  %p590_p7 = scmp.lt.s32.totalorder %s584_s8, %s584_s8 }
  0x2d   :  { %p591_p8 = por %p590_p7, %p589_p6 }
  0x2f   :  { %p592_p9 = pnand %p591_p8, %p585_p5 }
  0x31   :  { %595 = shalt.err (!%p592_p9)
}
  0x32   :  { %53 = dma.hbm_to_vmem [thread:$0]  %s766_s4, 512, %s48_s23, [#allocation6], %s626_s9, %s626_s9, %s627_s10  }
  0x33   :  { %618 = dma.done.wait [#allocation3], 256  }
  0x34   :  { %619 = vsyncadd [#allocation3], 4294967040 }
  0x35   :  { %620 = dma.done.wait [#allocation6], 768  }
  0x36   :  { %621 = vsyncadd [#allocation6], 4294966528  ;;  %v88_v0 = vlaneseq  ;;  %v65_v4 = vld [vmem:[#allocation2] sm:$0xff]  ;;  %v66_v5 = vld [vmem:[#allocation2 + $0x8] sm:$0xff]  ;;  %vm79_vm0 = vcmask 261120   ;;  %vm98_vm1 = vcmask 1041409  }
  0x37   :  { %520 = vtanh.f32 %v65_v4  ;;  %v467_v6 = vld [vmem:[%s765_s3] ss:$0 sm:$0xff]  ;;  %vm101_vm2 = vcmask 58368   ;;  %v629_v24 = vmov 0   ;;  %v630_v50 = vmov 0.0   ;;  %v199_v60 = vld [vmem:[#allocation5] sm:$0xff] }
  0x38   :  { %v89_v1 = vand.u32 127, %v88_v0  ;;  %v91_v2 = vshrl.u32 %v88_v0, 7  ;;  %522 = vtanh.f32 %v66_v5  ;;  %v67_v13 = vld [vmem:[%s764_s2] sm:$0x3]  ;;  %518 = vset.pattern.permute.xlu1 %v629_v24  ;;  %519 = vset.pattern.permute.xlu0 %v629_v24  ;;  %vm631_vm3 = vmmov 0   ;;  %v200_v63 = vld [vmem:[#allocation5 + $0x8] sm:$0xff] }
  0x39   :  { %481 = vmatprep.subr.mxu1 %v630_v50  ;;  %483 = vmatprep.mubr.msk.f32.mxu1 %vm631_vm3, %v630_v50  ;;  %vm209_vm4 = vcmask 64512   ;;  %v363_v4 = vld [vmem:[#allocation7 + $0x8] sm:$0xff]  ;;  %s633_s10 = smov [#allocation8]  }
  0x3a   :  { %v721_v3 = vsub.s32 %v89_v1, %v91_v2  ;;  %v112_v14 = vsub.s32 1, %v91_v2  ;;  %v108_v22 = vsub.s32 0, %v91_v2  ;;  %482 = vmatpush3.msra.mxu1 %v199_v60  ;;  %499 = vmatprep.mubr.msk.f32.mxu0 %vm631_vm3, %v630_v50  ;;  %v362_v2 = vld [vmem:[#allocation7] sm:$0xff]  ;;  %s457_s13 = sshll.u32 %s633_s10, 4  ;;  %s458_s13 = int_to_ptr.vmem [resolvable:$true] %s457_s13 }
  0x3b   :  { %486 = vmatprep.subr.mxu1 %v630_v50  ;;  %v503_v5 = vpack.c.bf16 %v363_v4, %v362_v2  ;;  %s596_s14 = scalar_lea.vmem %s458_s13, 32  ;;  %p601_p11 = scmp.lt.s32.totalorder %s458_s13, %s458_s13 }
  0x3c   :  { %v133_v15 = vrot.slane %v67_v13, %v112_v14  ;;  %v126_v23 = vrot.slane %v67_v13, %v108_v22  ;;  %p597_p10 = scmp.ne.s32.totalorder %s458_s13, %s596_s14  ;;  %p602_p12 = scmp.lt.s32.totalorder %s596_s14, %s596_s14 }
  0x3e   :  { %p603_p13 = por %p602_p12, %p601_p11 }
  0x40   :  { %p604_p0 = pnand %p603_p13, %p597_p10 }
  0x41   :  { %v521_v7 = vpop.eup %520 }
  0x42   :  { %v523_v8 = vpop.eup %522  ;;  %v77_v9 = vmul.f32 %v521_v7, %v467_v6  ;;  %v364_v7 = vld [vmem:[#allocation7 + $0x10] sm:$0xff] }
  0x43   :  { %v78_v10 = vmul.f32 %v523_v8, %v467_v6  ;;  %v632_v6 = vmov 0.0|0.0   ;;  %v365_v8 = vld [vmem:[#allocation7 + $0x18] sm:$0xff] }
  0x44   :  { %v80_v11 = vsel %vm79_vm0, %v77_v9, 0.0  ;;  %502 = vmatprep.subr.bf16.mxu0 %v632_v6  ;;  %v506_v9 = vpack.c.bf16 %v365_v8, %v364_v7 }
  0x45   :  { %81 = vadd.xlane.f32.xlu0 %v80_v11  ;;  %v83_v12 = vsel %vm79_vm0, %v78_v10, 0.0  ;;  %504 = vmatpush3.bf16.msra.mxu0 %v503_v5 }
  0x46   :  { %505 = vmatprep.subr.bf16.mxu0 %v632_v6 }
  0x49   :  { %84 = vadd.xlane.f32.xlu0 %v83_v12  ;;  %507 = vmatpush3.bf16.msra.mxu0 %v506_v9 }
  0x5f   :  { %135 = vbcast.lane.b32.xlu0 %v133_v15, 256 }
  0xd2   :  { %v82_v16 = vpop.xlane.xlu0 %81 }
  0xd3   :  { %v93_v18 = vrot.slane %v82_v16, %v721_v3 }
  0xd6   :  { %v85_v17 = vpop.xlane.xlu0 %84 }
  0xd7   :  { %v97_v19 = vrot.slane %v85_v17, %v721_v3 }
  0xd9   :  { %v99_v20 = vsel %vm98_vm1, %v97_v19, %v93_v18 }
  0xda   :  { %v102_v21 = vsel %vm101_vm2, %v99_v20, -inf  ;;  %v136_v32 = vpop.permute.xlu0 %135 }
  0xdb   :  { %103 = vmax.xlane.f32.xlu1 %v102_v21 }
  0xec   :  { %128 = vbcast.lane.b32.xlu1 %v126_v23, 256 }
 0x168   :  { %v104_v25 = vpop.xlane.xlu1 %103 }
 0x169   :  { %v109_v26 = vrot.slane %v104_v25, %v108_v22  ;;  %v113_v27 = vrot.slane %v104_v25, %v112_v14 }
 0x16b   :  { %v116_v28 = vsub.f32 %v82_v16, %v109_v26  ;;  %v117_v29 = vsub.f32 %v85_v17, %v113_v27 }
 0x16c   :  { %v129_v36 = vpop.permute.xlu1 %128 }
 0x16d   :  { %v118_v30 = vmul.f32 1.442695, %v116_v28  ;;  %v120_v31 = vmul.f32 1.442695, %v117_v29 }
 0x16f   :  { %524 = vpow2.f32 %v118_v30 }
 0x170   :  { %526 = vpow2.f32 %v120_v31 }
 0x179   :  { %v525_v33 = vpop.eup %524 }
 0x17a   :  { %v527_v34 = vpop.eup %526  ;;  %165 = vperm.xlu1 %518, %v525_v33   ;;  %v139_v37 = vmul.f32 %v525_v33, %v129_v36 }
 0x17b   :  { %v140_v35 = vmul.f32 %v527_v34, %v136_v32 }
 0x17d   :  { %147 = vperm.xlu0 %519, %v140_v35  }
 0x17e   :  { %168 = vperm.xlu1 %518, %v527_v34  }
 0x182   :  { %144 = vperm.xlu1 %518, %v139_v37  }
 0x1f9   :  { %v166_v38 = vpop.permute.xlu1 %165 }
 0x1fa   :  { %v173_v40 = vrot.slane %v166_v38, %v721_v3 }
 0x1fc   :  { %v148_v42 = vpop.permute.xlu0 %147 }
 0x1fd   :  { %v169_v39 = vpop.permute.xlu1 %168  ;;  %v156_v46 = vrot.slane %v148_v42, %v721_v3 }
 0x1fe   :  { %v177_v41 = vrot.slane %v169_v39, %v721_v3 }
 0x200   :  { %v178_v43 = vsel %vm98_vm1, %v177_v41, %v173_v40 }
 0x201   :  { %v145_v44 = vpop.permute.xlu1 %144  ;;  %v180_v45 = vsel %vm101_vm2, %v178_v43, 0.0 }
 0x202   :  { %v152_v47 = vrot.slane %v145_v44, %v721_v3  ;;  %181 = vadd.xlane.f32.xlu1 %v180_v45 }
 0x204   :  { %v157_v48 = vsel %vm98_vm1, %v156_v46, %v152_v47 }
 0x205   :  { %v159_v49 = vsel %vm101_vm2, %v157_v48, 0.0 }
 0x206   :  { %160 = vadd.xlane.f32.xlu0 %v159_v49 }
 0x28f   :  { %v182_v51 = vpop.xlane.xlu1 %181 }
 0x290   :  { %v183_v52 = vmul.f32 1e-12, %v182_v51 }
 0x293   :  { %v161_v53 = vpop.xlane.xlu0 %160 }
 0x294   :  { %v184_v54 = vadd.f32 %v183_v52, %v161_v53 }
 0x296   :  { %528 = vrcp.f32 %v184_v54 }
 0x2a0   :  { %v529_v55 = vpop.eup %528 }
 0x2a1   :  { %v194_v56 = vrot.slane %v529_v55, %v112_v14  ;;  %v190_v57 = vrot.slane %v529_v55, %v108_v22 }
 0x2a3   :  { %v198_v58 = vmul.f32 %v194_v56, %v140_v35  ;;  %v197_v59 = vmul.f32 %v190_v57, %v139_v37 }
 0x2a5   :  { %284 = vperm.xlu1 %518, %v198_v58   ;;  %203 = vperm.xlu0 %519, %v197_v59  }
 0x324   :  { %v204_v61 = vpop.permute.xlu0 %203  ;;  %v285_v0 = vpop.permute.xlu1 %284 }
 0x325   :  { %v208_v62 = vrot.slane %v204_v61, %v721_v3  ;;  %v289_v1 = vrot.slane %v285_v0, %v721_v3  ;;  %v470_v3 = vld [vmem:[%s767_s5] ss:$0 sm:$0xff] }
 0x327   :  { %484 = vmatmul.mubr.msk.f32.vlgmr.msra.gmra.mrb[0].mxu1 %vm209_vm4, %v208_v62 }
 0x328   :  { %487 = vmatpush3.msra.mxu1 %v200_v63  ;;  %488 = vmatprep.mubr.msk.f32.mxu1 %vm631_vm3, %v630_v50 }
 0x32b   :  { %489 = vmatmul.mubr.msk.f32.vlgmr.msra.gmra.mrb[2].mxu1 %vm209_vm4, %v289_v1 }
 0x3fa   :  { %v278_v10 = vpop.f32.mrb[0].mxu1 }
 0x3fb   :  { %v485_v11 = vpop.f32.mrb[1].mxu1 }
 0x3fe   :  { %v358_v12 = vpop.f32.mrb[2].mxu1 }
 0x3ff   :  { %v375_v13 = vrot.slane %v358_v12, 7  ;;  %v490_v14 = vpop.f32.mrb[3].mxu1 }
 0x401   :  { %v376_v15 = vsel %vm98_vm1, %v375_v13, %v278_v10 }
 0x402   :  { %500 = vmatmul.mubr.msk.f32.vlgmr.msra.gmra.mrb[0].mxu0 %vm79_vm0, %v376_v15 }
 0x4d5   :  { %v445_v16 = vpop.f32.mrb[0].mxu0 }
 0x4d6   :  { %v446_v17 = vadd.f32 %v470_v3, %v445_v16  ;;  %v501_v18 = vpop.f32.mrb[1].mxu0 }
 0x4d8   :  { %v449_v19 = vmax.f32 %v446_v17, 0.0 }
 0x4da   :  { %450 = vst [vmem:[#allocation8] sm:$0x3] %v449_v19 }
 0x4db   :  { %607 = shalt.err (!%p604_p0)
}
 0x4dc   :  { %s608_s17 = scalar_lea.hbm %s768_s6, 32 }
 0x4dd   :  { %p609_p1 = scmp.ne.s32.totalorder %s768_s6, %s608_s17  ;;  %p612_p2 = scmp.lt.u32.totalorder %s608_s17, %s768_s6 }
 0x4df   :  { %p614_p3 = pnand %p612_p2, %p609_p1 }
 0x4e1   :  { %617 = shalt.err (!%p614_p3)
}
 0x4e2   :  { %460 = dma.vmem_to_hbm [thread:$0]  %s458_s13, 32, %s768_s6, [#allocation4]  }
 0x4e3   :  { %622 = dma.done.wait [#allocation4], 32  }
 0x4e4   :  { %623 = vsyncadd [#allocation4], 4294967264 }
 0x4e5   :  { %464 = vsyncpa [#allocation3], 1 }
 0x4e6   :  { %465 = vsyncpa [#allocation6], 1 }
 0x4e7   :  { %466 = vsyncpa [#allocation4], 1 }

</bundles_post_ra>
